<compile_context>
chip_gen: v7x
topology: tpu7x:2x2x1
jax: 0.10.0
libtpu: 0.0.40
codegen_flags: <defaults>
</compile_context>

<pallas_src>
import jax
import jax.numpy as jnp
from jax.experimental import pallas as pl
from jax.experimental.pallas import tpu as pltpu

_LANES = 128            # vreg lane width: keep last dim lane-dense
_MAX_BLOCK_ROWS = 2048  # 2048x128 f32 = 1 MiB/tile; in+out double-buffered ~4 MiB
_SMALL_N = 1 << 20      # below ~1M elements, fused XLA sigmoid beats a kernel launch


def _round_up(x, m):
    return ((x + m - 1) // m) * m


def _linear_sigmoid_kernel(w_ref, b_ref, x_ref, o_ref):
    # w_ref, b_ref: (1, 1) scalars in SMEM (no padded (8,128) VMEM tiles).
    # x_ref, o_ref: (block_rows, 128) lane-dense VMEM tiles -> unmasked vst.
    w = w_ref[0, 0]
    b = b_ref[0, 0]
    z = x_ref[...].astype(jnp.float32) * w + b          # valid for f_in = f_out = 1
    # Exact sigmoid with ONE EUP transcendental (no approx-rcp error, no exp->inf).
    o_ref[...] = 0.5 * jnp.tanh(0.5 * z) + 0.5


def net_forward(x, weight, bias, *, force_pallas=False):
    """sigmoid(x @ weight.T + bias) for the 1x1 Linear of `Net`.

    x: (N, 1); weight: (1, 1); bias: (1,). Returns (N, 1) float32.
    """
    n, f_in = x.shape
    f_out = weight.shape[0]
    if f_in != 1 or f_out != 1:
        # TODO(synk): generalize to an MXU jnp.dot path (K-reduction grid axis,
        # MXU-friendly tiles) if input_size/output_size ever exceed 1.
        raise NotImplementedError("Pallas kernel specialized for the 1x1 Linear.")

    w_scalar = weight.reshape(()).astype(jnp.float32)
    b_scalar = bias.reshape(()).astype(jnp.float32)

    # Tiny inputs: a fused XLA elementwise op is strictly faster than a
    # standalone kernel (launch + repack dominate <1 us of data movement).
    if not force_pallas and n * f_in < _SMALL_N:
        return jax.nn.sigmoid(x.astype(jnp.float32) * w_scalar + b_scalar)

    # ---- lane-dense repack: (N, 1) -> (rows_padded, 128), minimal padding ----
    rows = pl.cdiv(n, _LANES)                       # 128-lane rows needed
    n_blocks = pl.cdiv(rows, _MAX_BLOCK_ROWS)       # cap tile at ~1 MiB
    if rows >= 16:
        n_blocks = max(n_blocks, 2)                 # >=2 parallel steps for v7x's 2 TCs
    block_rows = _round_up(pl.cdiv(rows, n_blocks), 8)   # sublane-aligned
    rows_padded = n_blocks * block_rows
    padded_len = rows_padded * _LANES

    flat = x.reshape(-1)                            # free bitcast of (N, 1)
    if padded_len != n:
        flat = jnp.pad(flat, (0, padded_len - n))
    x2d = flat.reshape(rows_padded, _LANES)

    w2d = weight.reshape(1, 1).astype(jnp.float32)
    b2d = bias.reshape(1, 1).astype(jnp.float32)

    # TODO(synk): optional bf16 output store would halve write traffic on v5e/v6e
    # if downstream tolerates it; kept f32 here for exact parity with PyTorch.
    out2d = pl.pallas_call(
        _linear_sigmoid_kernel,
        out_shape=jax.ShapeDtypeStruct((rows_padded, _LANES), jnp.float32),
        grid=(n_blocks,),
        in_specs=[
            pl.BlockSpec(memory_space=pltpu.MemorySpace.SMEM),   # weight scalar
            pl.BlockSpec(memory_space=pltpu.MemorySpace.SMEM),   # bias scalar
            pl.BlockSpec((block_rows, _LANES), lambda i: (i, 0)),
        ],
        out_specs=pl.BlockSpec((block_rows, _LANES), lambda i: (i, 0)),
        compiler_params=pltpu.CompilerParams(
            dimension_semantics=("parallel",),   # megacore / 2-TC sharding on v7x
        ),
    )(w2d, b2d, x2d)

    out = out2d.reshape(-1)
    if padded_len != n:
        out = out[:n]
    return out.reshape(n, f_out)


if __name__ == "__main__":
    key = jax.random.PRNGKey(0)
    input_size = 1
    output_size = 1

    # Deterministic params matching the PyTorch module's __init__
    weight = jnp.array([[1.0]], dtype=jnp.float32)   # fc1.weight
    bias = jnp.array([0.0], dtype=jnp.float32)       # fc1.bias

    # Small shape consistent with the module; force the Pallas path so the
    # kernel itself is exercised.
    batch = 8
    x_small = jax.random.normal(key, (batch, input_size), dtype=jnp.float32)
    out_small = jax.block_until_ready(
        net_forward(x_small, weight, bias, force_pallas=True))
    ref_small = jax.nn.sigmoid(x_small @ weight.T + bias)
    assert out_small.shape == (batch, output_size)
    assert jnp.allclose(out_small, ref_small, atol=1e-5), "small-batch mismatch"

    # The small-N fused-XLA fallback must agree too.
    out_fb = jax.block_until_ready(net_forward(x_small, weight, bias))
    assert jnp.allclose(out_fb, ref_small, atol=1e-5), "fallback mismatch"

    # Larger batch: exercises the multi-step (2 parallel steps) grid path.
    big = 70_000
    x_big = jax.random.normal(jax.random.PRNGKey(1), (big, input_size),
                              dtype=jnp.float32)
    out_big = jax.block_until_ready(
        net_forward(x_big, weight, bias, force_pallas=True))
    ref_big = jax.nn.sigmoid(x_big @ weight.T + bias)
    assert out_big.shape == (big, output_size)
    assert jnp.allclose(out_big, ref_big, atol=1e-5), "large-batch mismatch"

    print("KERNEL_OK")
</pallas_src>

<mosaic_0001>
module attributes {stable_mosaic.version = 11 : i64} {
  func.func @_linear_sigmoid_kernel(%arg0: i32, %arg1: memref<1x1xf32, #tpu.memory_space<smem>>, %arg2: memref<1x1xf32, #tpu.memory_space<smem>>, %arg3: memref<8x128xf32, #tpu.memory_space<vmem>>, %arg4: memref<8x128xf32, #tpu.memory_space<vmem>>) attributes {dimension_semantics = [#tpu.dimension_semantics<parallel>], iteration_bounds = array<i64: 1>, scalar_prefetch = 0 : i64, scratch_operands = 0 : i64, tpu.core_type = #tpu.core_type<tc>, window_params = [{transform_indices = @transform_0, window_bounds = array<i64: 1, 1>}, {transform_indices = @transform_1, window_bounds = array<i64: 1, 1>}, {transform_indices = @transform_2, window_bounds = array<i64: 8, 128>}, {transform_indices = @transform_3, window_bounds = array<i64: 8, 128>}]} {
    %c0 = arith.constant 0 : index
    %c0_0 = arith.constant 0 : index
    %0 = memref.load %arg1[%c0, %c0_0] : memref<1x1xf32, #tpu.memory_space<smem>>
    %c0_1 = arith.constant 0 : index
    %c0_2 = arith.constant 0 : index
    %1 = memref.load %arg2[%c0_1, %c0_2] : memref<1x1xf32, #tpu.memory_space<smem>>
    %c0_3 = arith.constant 0 : index
    %c0_4 = arith.constant 0 : index
    %2 = vector.load %arg3[%c0_3, %c0_4] : memref<8x128xf32, #tpu.memory_space<vmem>>, vector<8x128xf32>
    %3 = vector.broadcast %0 : f32 to vector<8x128xf32>
    %4 = arith.mulf %2, %3 : vector<8x128xf32>
    %5 = vector.broadcast %1 : f32 to vector<8x128xf32>
    %6 = arith.addf %4, %5 : vector<8x128xf32>
    %cst = arith.constant 5.000000e-01 : f32
    %7 = vector.broadcast %cst : f32 to vector<8x128xf32>
    %8 = arith.mulf %7, %6 : vector<8x128xf32>
    %9 = math.tanh %8 : vector<8x128xf32>
    %cst_5 = arith.constant 5.000000e-01 : f32
    %10 = vector.broadcast %cst_5 : f32 to vector<8x128xf32>
    %11 = arith.mulf %10, %9 : vector<8x128xf32>
    %cst_6 = arith.constant 5.000000e-01 : f32
    %12 = vector.broadcast %cst_6 : f32 to vector<8x128xf32>
    %13 = arith.addf %11, %12 : vector<8x128xf32>
    %c0_7 = arith.constant 0 : index
    %c0_8 = arith.constant 0 : index
    %14 = vector.load %arg4[%c0_7, %c0_8] : memref<8x128xf32, #tpu.memory_space<vmem>>, vector<8x128xf32>
    tpu.vector_store %arg4[%c0_7, %c0_8], %13 {strides = array<i32>} : memref<8x128xf32, #tpu.memory_space<vmem>>, vector<8x128xf32>,
    return
  }
  func.func @transform_0(%arg0: i32) -> (i32, i32) {
    %c0_i32 = arith.constant 0 : i32
    %c0_i32_0 = arith.constant 0 : i32
    %c0_i32_1 = arith.constant 0 : i32
    return %c0_i32, %c0_i32_0 : i32, i32
  }
  func.func @transform_1(%arg0: i32) -> (i32, i32) {
    %c0_i32 = arith.constant 0 : i32
    %c0_i32_0 = arith.constant 0 : i32
    %c0_i32_1 = arith.constant 0 : i32
    return %c0_i32, %c0_i32_0 : i32, i32
  }
  func.func @transform_2(%arg0: i32) -> (i32, i32) {
    %c0_i32 = arith.constant 0 : i32
    %c0_i32_0 = arith.constant 0 : i32
    return %arg0, %c0_i32 : i32, i32
  }
  func.func @transform_3(%arg0: i32) -> (i32, i32) {
    %c0_i32 = arith.constant 0 : i32
    %c0_i32_0 = arith.constant 0 : i32
    return %arg0, %c0_i32 : i32, i32
  }
}

</mosaic_0001>

<bundles_post_ra>
// kernel: tpu_custom_call.1
= control target key start
LH: loop header
LB: loop body
LE: loop exit
PB: predicated region body
PF: predicated region fallthrough
CT: control target
= control target key end

     0   :  { %10 = vsyncpa [#allocation5], 0  ;;  %s160_s0 = inlined_call_operand.<no memory space> [shape: f32[1,1], index: 0, kind: input, shape index: {}]   ;;  %s161_s1 = inlined_call_operand.<no memory space> [shape: f32[1,1], index: 1, kind: input, shape index: {}]   ;;  %s162_s2 = inlined_call_operand.hbm [shape: f32[8,128], index: 2, kind: input, shape index: {}]   ;;  %s163_s3 = inlined_call_operand.hbm [shape: f32[8,128], index: 3, kind: output, shape index: {}]  }
   0x1   :  { %11 = vsyncpa [#allocation6], 0  ;;  %s108_s12 = smov [#allocation4]   ;;  %s60_s16 = scalar_lea.hbm %s162_s2, 128 }
   0x2   :  { %s22_s13 = sshll.u32 %s108_s12, 4  ;;  %p61_p0 = scmp.ne.s32.totalorder %s162_s2, %s60_s16  ;;  %s23_s13 = int_to_ptr.vmem [resolvable:$true] %s22_s13 }
   0x3   :  { %p64_p1 = scmp.lt.u32.totalorder %s60_s16, %s162_s2 }
   0x5   :  { %p66_p2 = pnand %p64_p1, %p61_p0 }
   0x7   :  { %69 = shalt.err (!%p66_p2)
}
   0x8   :  { %s70_s21 = scalar_lea.vmem %s23_s13, 128  ;;  %p75_p4 = scmp.lt.s32.totalorder %s23_s13, %s23_s13 }
   0x9   :  { %p71_p3 = scmp.ne.s32.totalorder %s23_s13, %s70_s21  ;;  %p76_p5 = scmp.lt.s32.totalorder %s70_s21, %s70_s21 }
   0xb   :  { %p77_p6 = por %p76_p5, %p75_p4 }
   0xd   :  { %p78_p7 = pnand %p77_p6, %p71_p3 }
   0xf   :  { %81 = shalt.err (!%p78_p7)
}
  0x10   :  { %25 = dma.hbm_to_vmem [thread:$0]  %s162_s2, 128, %s23_s13, [#allocation5]  }
  0x11   :  { %104 = dma.done.wait [#allocation5], 128  }
  0x12   :  { %105 = vsyncadd [#allocation5], 4294967168  ;;  %v32_v0 = vstv %s160_s0  ;;  %v31_v1 = vld [vmem:[#allocation4] sm:$0xff]  ;;  %v34_v2 = vstv %s161_s1  ;;  %s109_s28 = smov [#allocation7]  }
  0x13   :  { %v33_v3 = vmul.f32 %v32_v0, %v31_v1  ;;  %s47_s29 = sshll.u32 %s109_s28, 4  ;;  %s48_s29 = int_to_ptr.vmem [resolvable:$true] %s47_s29 }
  0x14   :  { %s82_s2 = scalar_lea.vmem %s48_s29, 128  ;;  %p87_p9 = scmp.lt.s32.totalorder %s48_s29, %s48_s29 }
  0x15   :  { %v35_v4 = vadd.f32 %v34_v2, %v33_v3  ;;  %p83_p8 = scmp.ne.s32.totalorder %s48_s29, %s82_s2  ;;  %p88_p10 = scmp.lt.s32.totalorder %s82_s2, %s82_s2 }
  0x17   :  { %v36_v5 = vmul.f32 0.5, %v35_v4  ;;  %p89_p11 = por %p88_p10, %p87_p9 }
  0x19   :  { %58 = vtanh.f32 %v36_v5  ;;  %p90_p12 = pnand %p89_p11, %p83_p8 }
  0x23   :  { %v59_v6 = vpop.eup %58 }
  0x24   :  { %v38_v7 = vmul.f32 0.5, %v59_v6 }
  0x26   :  { %v39_v8 = vadd.f32 0.5, %v38_v7 }
  0x28   :  { %40 = vst [vmem:[#allocation7] sm:$0xff] %v39_v8 }
  0x29   :  { %93 = shalt.err (!%p90_p12)
}
  0x2a   :  { %s94_s30 = scalar_lea.hbm %s163_s3, 128 }
  0x2b   :  { %p95_p13 = scmp.ne.s32.totalorder %s163_s3, %s94_s30  ;;  %p98_p0 = scmp.lt.u32.totalorder %s94_s30, %s163_s3 }
  0x2d   :  { %p100_p1 = pnand %p98_p0, %p95_p13 }
  0x2f   :  { %103 = shalt.err (!%p100_p1)
}
  0x30   :  { %50 = dma.vmem_to_hbm [thread:$0]  %s48_s29, 128, %s163_s3, [#allocation6]  }
  0x31   :  { %106 = dma.done.wait [#allocation6], 128  }
  0x32   :  { %107 = vsyncadd [#allocation6], 4294967168 }
  0x33   :  { %54 = vsyncpa [#allocation5], 1 }
  0x34   :  { %55 = vsyncpa [#allocation6], 1 }

</bundles_post_ra>
